<compile_context>
chip_gen: v7x
topology: tpu7x:2x2x1
jax: 0.10.0
libtpu: 0.0.40
codegen_flags: <defaults>
</compile_context>

<pallas_src>
import functools

import jax
import jax.numpy as jnp
import numpy as np
from jax.experimental import pallas as pl
from jax.experimental.pallas import tpu as pltpu

LANES = 128
TARGET_BLOCK_BYTES = 2 << 20            # ~2 MiB per input stream per buffer
_MEGACORE_KINDS = ("v4", "v5p", "v7")   # chips with 2 TensorCores / megacore


def _round_up(v, m):
    return ((v + m - 1) // m) * m


def _num_shards():
    """2 only on dual-TensorCore / megacore chips; 1 elsewhere."""
    try:
        kind = jax.devices()[0].device_kind.lower()
    except Exception:
        return 1
    return 2 if any(k in kind for k in _MEGACORE_KINDS) else 1


def _tile_rows(rows, itemsize):
    """Dtype-aware block height: ~2 MiB per stream, never more than needed."""
    t = max(8, (TARGET_BLOCK_BYTES // (LANES * itemsize)) // 8 * 8)
    return min(t, _round_up(rows, 8))


def _to_2d(a):
    """Free row-major (rows, 128) view; sub-128 lane tail returned separately."""
    flat = jnp.ravel(a)                  # no copy for contiguous arrays
    n = flat.size
    rows = n // LANES
    if rows == 0:
        # Tiny tensor: pad to a single (8, 128) block; zero pads contribute 0.
        flat = jnp.pad(flat, (0, 8 * LANES - n))
        return flat.reshape(8, LANES), None, n
    tail = None
    if rows * LANES != n:
        # TODO(synk): ragged lane tail -> the prefix slice materializes one
        # HBM copy of this tensor; the <128-elem tail is added in the epilogue.
        tail = flat[rows * LANES:]
        flat = flat[: rows * LANES]
    return flat.reshape(rows, LANES), tail, n


def _pair_update(x_ref, y_ref, acc_ref, g, *, rows, tile, nblk, grid_blocks, op):
    """acc += per-lane/per-sublane partial sums of op(x - y) for one pair."""

    def _accumulate(d):
        # (tile,128) -> (tile//8, 8, 128) groups whole vregs: pure VALU adds,
        # no per-block cross-sublane reduce.
        acc_ref[...] += jnp.sum(d.reshape(-1, 8, LANES), axis=0)

    def _full_block():
        d = x_ref[...].astype(jnp.float32) - y_ref[...].astype(jnp.float32)
        _accumulate(op(d))

    ragged = rows % tile
    if ragged:
        def _last_block():  # only the final block pays for the row mask
            d = x_ref[...].astype(jnp.float32) - y_ref[...].astype(jnp.float32)
            row_ids = jax.lax.broadcasted_iota(jnp.int32, (tile, LANES), 0)
            d = jnp.where(row_ids < ragged, d, 0.0)   # mask before op -> NaN-safe
            _accumulate(op(d))
        pl.when(g < nblk - 1)(_full_block)
        pl.when(g == nblk - 1)(_last_block)
    elif grid_blocks > nblk:       # this pair has fewer blocks than the grid
        pl.when(g < nblk)(_full_block)
    else:
        _full_block()


def _linear_loss_kernel(x0_ref, y0_ref, x1_ref, y1_ref, out_ref,
                        acc0_ref, acc1_ref, *,
                        rows0, rows1, tile0, tile1, nblk0, nblk1,
                        blocks_per_shard, grid_blocks):
    s = pl.program_id(0)            # shard axis ("parallel")
    i = pl.program_id(1)            # reduction axis ("arbitrary")
    g = s * blocks_per_shard + i    # global block index

    @pl.when(i == 0)
    def _init():
        acc0_ref[...] = jnp.zeros_like(acc0_ref)
        acc1_ref[...] = jnp.zeros_like(acc1_ref)

    # MSE numerator: sum of squared diffs.
    _pair_update(x0_ref, y0_ref, acc0_ref, g, rows=rows0, tile=tile0,
                 nblk=nblk0, grid_blocks=grid_blocks, op=lambda d: d * d)
    # L1 numerator: sum of abs diffs.
    _pair_update(x1_ref, y1_ref, acc1_ref, g, rows=rows1, tile=tile1,
                 nblk=nblk1, grid_blocks=grid_blocks, op=jnp.abs)

    @pl.when(i == pl.num_programs(1) - 1)
    def _finalize():                # one cross-sublane reduce per shard
        a0 = jnp.sum(acc0_ref[...], axis=0, keepdims=True)      # (1, 128)
        a1 = jnp.sum(acc1_ref[...], axis=0, keepdims=True)      # (1, 128)
        out_ref[...] = jnp.concatenate([a0, a1], axis=0)[None]  # (1, 2, 128)


def linear_loss(x, y, weights):
    """x, y: pairs of arrays (any shapes). Returns the scalar f32 weighted loss."""
    assert x[0].shape == y[0].shape and x[1].shape == y[1].shape

    x0m, x0t, n0 = _to_2d(x[0]); y0m, y0t, _ = _to_2d(y[0])
    x1m, x1t, n1 = _to_2d(x[1]); y1m, y1t, _ = _to_2d(y[1])
    rows0, rows1 = x0m.shape[0], x1m.shape[0]

    tile0 = _tile_rows(rows0, max(x0m.dtype.itemsize, y0m.dtype.itemsize))
    tile1 = _tile_rows(rows1, max(x1m.dtype.itemsize, y1m.dtype.itemsize))
    nblk0 = pl.cdiv(rows0, tile0)
    nblk1 = pl.cdiv(rows1, tile1)

    num_shards = _num_shards()
    bps = pl.cdiv(max(nblk0, nblk1), num_shards)       # blocks per shard
    grid_blocks = num_shards * bps

    def _in_spec(tile, nblk):
        if grid_blocks <= nblk:
            idx = lambda s, i: (s * bps + i, 0)
        else:
            # Clamp: repeated block index => pipeline skips the redundant DMA.
            idx = lambda s, i: (jnp.minimum(s * bps + i, nblk - 1), 0)
        return pl.BlockSpec((tile, LANES), idx)

    kernel = functools.partial(
        _linear_loss_kernel,
        rows0=rows0, rows1=rows1, tile0=tile0, tile1=tile1,
        nblk0=nblk0, nblk1=nblk1,
        blocks_per_shard=bps, grid_blocks=grid_blocks)

    # VMEM budget: 4 streams x 2 buffers x block + output + scratch (+ headroom).
    need = 2 * LANES * (tile0 * (x0m.dtype.itemsize + y0m.dtype.itemsize)
                        + tile1 * (x1m.dtype.itemsize + y1m.dtype.itemsize))
    need += 2 * (2 * LANES * 4) + 2 * (8 * LANES * 4)
    vmem_limit = int(min(max(need + (8 << 20), 16 << 20), 48 << 20))

    bytes_in = sum(int(a.size) * a.dtype.itemsize for a in (x0m, y0m, x1m, y1m))
    cost = pl.CostEstimate(flops=3 * (int(x0m.size) + int(x1m.size)),
                           transcendentals=0,
                           bytes_accessed=bytes_in + num_shards * 2 * LANES * 4)

    partials = pl.pallas_call(
        kernel,
        out_shape=jax.ShapeDtypeStruct((num_shards, 2, LANES), jnp.float32),
        grid_spec=pltpu.PrefetchScalarGridSpec(
            num_scalar_prefetch=0,
            grid=(num_shards, bps),
            in_specs=[_in_spec(tile0, nblk0), _in_spec(tile0, nblk0),
                      _in_spec(tile1, nblk1), _in_spec(tile1, nblk1)],
            out_specs=pl.BlockSpec((1, 2, LANES), lambda s, i: (s, 0, 0)),
            scratch_shapes=[pltpu.VMEM((8, LANES), jnp.float32),
                            pltpu.VMEM((8, LANES), jnp.float32)]),
        compiler_params=pltpu.CompilerParams(
            dimension_semantics=("parallel", "arbitrary"),
            vmem_limit_bytes=vmem_limit),
        cost_estimate=cost,
    )(x0m, y0m, x1m, y1m)

    # Tiny epilogue: collapse shard/lane partials, add lane tails, apply
    # means and weights (weights may be Python floats or traced JAX scalars).
    sums = jnp.sum(partials, axis=(0, 2))              # [sum d0^2, sum |d1|]
    s0, s1 = sums[0], sums[1]
    if x0t is not None:
        d = x0t.astype(jnp.float32) - y0t.astype(jnp.float32)
        s0 = s0 + jnp.sum(d * d)
    if x1t is not None:
        d = x1t.astype(jnp.float32) - y1t.astype(jnp.float32)
        s1 = s1 + jnp.sum(jnp.abs(d))
    return weights[0] * (s0 / n0) + weights[1] * (s1 / n1)


if __name__ == "__main__":
    key = jax.random.PRNGKey(0)
    k0, k1, k2, k3 = jax.random.split(key, 4)

    # Two (input, target) pairs, NCHW like the PyTorch usage.
    x0 = jax.random.normal(k0, (2, 4, 16, 16), dtype=jnp.float32)
    y0 = jax.random.normal(k1, (2, 4, 16, 16), dtype=jnp.float32)
    x1 = jax.random.normal(k2, (2, 4, 16, 16), dtype=jnp.float32)
    y1 = jax.random.normal(k3, (2, 4, 16, 16), dtype=jnp.float32)

    weights = (0.45, 0.55)

    loss = linear_loss((x0, x1), (y0, y1), weights)
    loss = jax.block_until_ready(loss)

    # pure-JAX reference: MSE(mean) * w0 + L1(mean) * w1
    ref = (jnp.mean((x0 - y0) ** 2) * weights[0]
           + jnp.mean(jnp.abs(x1 - y1)) * weights[1])
    np.testing.assert_allclose(np.asarray(loss), np.asarray(ref),
                               rtol=1e-5, atol=1e-5)

    print("KERNEL_OK")
</pallas_src>

<mosaic_0001>
module attributes {stable_mosaic.version = 11 : i64} {
  func.func @_linear_loss_kernel(%arg0: i32, %arg1: i32, %arg2: memref<16x128xf32, #tpu.memory_space<vmem>>, %arg3: memref<16x128xf32, #tpu.memory_space<vmem>>, %arg4: memref<16x128xf32, #tpu.memory_space<vmem>>, %arg5: memref<16x128xf32, #tpu.memory_space<vmem>>, %arg6: memref<1x2x128xf32, #tpu.memory_space<vmem>>, %arg7: memref<8x128xf32, #tpu.memory_space<vmem>>, %arg8: memref<8x128xf32, #tpu.memory_space<vmem>>) attributes {dimension_semantics = [#tpu.dimension_semantics<parallel>, #tpu.dimension_semantics<arbitrary>], iteration_bounds = array<i64: 1, 1>, scalar_prefetch = 0 : i64, scratch_operands = 2 : i64, tpu.core_type = #tpu.core_type<tc>, window_params = [{transform_indices = @transform_0, window_bounds = array<i64: 16, 128>}, {transform_indices = @transform_1, window_bounds = array<i64: 16, 128>}, {transform_indices = @transform_2, window_bounds = array<i64: 16, 128>}, {transform_indices = @transform_3, window_bounds = array<i64: 16, 128>}, {transform_indices = @transform_4, window_bounds = array<i64: 1, 2, 128>}]} {
    %c0_i32 = arith.constant 0 : i32
    %0 = arith.cmpi eq, %arg1, %c0_i32 : i32
    %1 = arith.extui %0 : i1 to i32
    %c0_i32_0 = arith.constant 0 : i32
    %2 = arith.cmpi ne, %1, %c0_i32_0 : i32
    scf.if %2 {
      %cst_19 = arith.constant 0.000000e+00 : f32
      %24 = vector.broadcast %cst_19 : f32 to vector<8x128xf32>
      %c0_20 = arith.constant 0 : index
      %c0_21 = arith.constant 0 : index
      %25 = vector.load %arg7[%c0_20, %c0_21] : memref<8x128xf32, #tpu.memory_space<vmem>>, vector<8x128xf32>
      tpu.vector_store %arg7[%c0_20, %c0_21], %24 {strides = array<i32>} : memref<8x128xf32, #tpu.memory_space<vmem>>, vector<8x128xf32>,
      %cst_22 = arith.constant 0.000000e+00 : f32
      %26 = vector.broadcast %cst_22 : f32 to vector<8x128xf32>
      %c0_23 = arith.constant 0 : index
      %c0_24 = arith.constant 0 : index
      %27 = vector.load %arg8[%c0_23, %c0_24] : memref<8x128xf32, #tpu.memory_space<vmem>>, vector<8x128xf32>
      tpu.vector_store %arg8[%c0_23, %c0_24], %26 {strides = array<i32>} : memref<8x128xf32, #tpu.memory_space<vmem>>, vector<8x128xf32>,
    } else {
    }
    %c0 = arith.constant 0 : index
    %c0_1 = arith.constant 0 : index
    %3 = vector.load %arg2[%c0, %c0_1] : memref<16x128xf32, #tpu.memory_space<vmem>>, vector<16x128xf32>
    %c0_2 = arith.constant 0 : index
    %c0_3 = arith.constant 0 : index
    %4 = vector.load %arg3[%c0_2, %c0_3] : memref<16x128xf32, #tpu.memory_space<vmem>>, vector<16x128xf32>
    %5 = arith.subf %3, %4 : vector<16x128xf32>
    %6 = arith.mulf %5, %5 : vector<16x128xf32>
    %c0_4 = arith.constant 0 : index
    %c0_5 = arith.constant 0 : index
    %7 = vector.load %arg7[%c0_4, %c0_5] : memref<8x128xf32, #tpu.memory_space<vmem>>, vector<8x128xf32>
    %8 = vector.shape_cast %6 : vector<16x128xf32> to vector<2x8x128xf32>
    %cst = arith.constant dense<0.000000e+00> : vector<8x128xf32>
    %9 = vector.multi_reduction <add>, %8, %cst [0] : vector<2x8x128xf32> to vector<8x128xf32>
    %10 = arith.addf %7, %9 : vector<8x128xf32>
    %c0_6 = arith.constant 0 : index
    %c0_7 = arith.constant 0 : index
    %11 = vector.load %arg7[%c0_6, %c0_7] : memref<8x128xf32, #tpu.memory_space<vmem>>, vector<8x128xf32>
    tpu.vector_store %arg7[%c0_6, %c0_7], %10 {strides = array<i32>} : memref<8x128xf32, #tpu.memory_space<vmem>>, vector<8x128xf32>,
    %c0_8 = arith.constant 0 : index
    %c0_9 = arith.constant 0 : index
    %12 = vector.load %arg4[%c0_8, %c0_9] : memref<16x128xf32, #tpu.memory_space<vmem>>, vector<16x128xf32>
    %c0_10 = arith.constant 0 : index
    %c0_11 = arith.constant 0 : index
    %13 = vector.load %arg5[%c0_10, %c0_11] : memref<16x128xf32, #tpu.memory_space<vmem>>, vector<16x128xf32>
    %14 = arith.subf %12, %13 : vector<16x128xf32>
    %15 = math.absf %14 : vector<16x128xf32>
    %c0_12 = arith.constant 0 : index
    %c0_13 = arith.constant 0 : index
    %16 = vector.load %arg8[%c0_12, %c0_13] : memref<8x128xf32, #tpu.memory_space<vmem>>, vector<8x128xf32>
    %17 = vector.shape_cast %15 : vector<16x128xf32> to vector<2x8x128xf32>
    %cst_14 = arith.constant dense<0.000000e+00> : vector<8x128xf32>
    %18 = vector.multi_reduction <add>, %17, %cst_14 [0] : vector<2x8x128xf32> to vector<8x128xf32>
    %19 = arith.addf %16, %18 : vector<8x128xf32>
    %c0_15 = arith.constant 0 : index
    %c0_16 = arith.constant 0 : index
    %20 = vector.load %arg8[%c0_15, %c0_16] : memref<8x128xf32, #tpu.memory_space<vmem>>, vector<8x128xf32>
    tpu.vector_store %arg8[%c0_15, %c0_16], %19 {strides = array<i32>} : memref<8x128xf32, #tpu.memory_space<vmem>>, vector<8x128xf32>,
    %c0_i32_17 = arith.constant 0 : i32
    %21 = arith.cmpi eq, %arg1, %c0_i32_17 : i32
    %22 = arith.extui %21 : i1 to i32
    %c0_i32_18 = arith.constant 0 : i32
    %23 = arith.cmpi ne, %22, %c0_i32_18 : i32
    scf.if %23 {
      %c0_19 = arith.constant 0 : index
      %c0_20 = arith.constant 0 : index
      %24 = vector.load %arg7[%c0_19, %c0_20] : memref<8x128xf32, #tpu.memory_space<vmem>>, vector<8x128xf32>
      %cst_21 = arith.constant dense<0.000000e+00> : vector<128xf32>
      %25 = vector.multi_reduction <add>, %24, %cst_21 [0] : vector<8x128xf32> to vector<128xf32>
      %26 = vector.shape_cast %25 : vector<128xf32> to vector<1x128xf32>
      %c0_22 = arith.constant 0 : index
      %c0_23 = arith.constant 0 : index
      %27 = vector.load %arg8[%c0_22, %c0_23] : memref<8x128xf32, #tpu.memory_space<vmem>>, vector<8x128xf32>
      %cst_24 = arith.constant dense<0.000000e+00> : vector<128xf32>
      %28 = vector.multi_reduction <add>, %27, %cst_24 [0] : vector<8x128xf32> to vector<128xf32>
      %29 = vector.shape_cast %28 : vector<128xf32> to vector<1x128xf32>
      %30 = tpu.concatenate %26, %29 in 0 : vector<1x128xf32>, vector<1x128xf32> -> vector<2x128xf32>
      %31 = vector.shape_cast %30 : vector<2x128xf32> to vector<1x2x128xf32>
      %c0_25 = arith.constant 0 : index
      %c0_26 = arith.constant 0 : index
      %c0_27 = arith.constant 0 : index
      %32 = vector.load %arg6[%c0_25, %c0_26, %c0_27] : memref<1x2x128xf32, #tpu.memory_space<vmem>>, vector<1x2x128xf32>
      tpu.vector_store %arg6[%c0_25, %c0_26, %c0_27], %31 {strides = array<i32>} : memref<1x2x128xf32, #tpu.memory_space<vmem>>, vector<1x2x128xf32>,
    } else {
    }
    return
  }
  func.func @transform_0(%arg0: i32, %arg1: i32) -> (i32, i32) {
    %c1_i32 = arith.constant 1 : i32
    %0 = arith.muli %arg0, %c1_i32 : i32
    %1 = arith.addi %0, %arg1 : i32
    %c0_i32 = arith.constant 0 : i32
    %c0_i32_0 = arith.constant 0 : i32
    return %1, %c0_i32 : i32, i32
  }
  func.func @transform_1(%arg0: i32, %arg1: i32) -> (i32, i32) {
    %c1_i32 = arith.constant 1 : i32
    %0 = arith.muli %arg0, %c1_i32 : i32
    %1 = arith.addi %0, %arg1 : i32
    %c0_i32 = arith.constant 0 : i32
    %c0_i32_0 = arith.constant 0 : i32
    return %1, %c0_i32 : i32, i32
  }
  func.func @transform_2(%arg0: i32, %arg1: i32) -> (i32, i32) {
    %c1_i32 = arith.constant 1 : i32
    %0 = arith.muli %arg0, %c1_i32 : i32
    %1 = arith.addi %0, %arg1 : i32
    %c0_i32 = arith.constant 0 : i32
    %c0_i32_0 = arith.constant 0 : i32
    return %1, %c0_i32 : i32, i32
  }
  func.func @transform_3(%arg0: i32, %arg1: i32) -> (i32, i32) {
    %c1_i32 = arith.constant 1 : i32
    %0 = arith.muli %arg0, %c1_i32 : i32
    %1 = arith.addi %0, %arg1 : i32
    %c0_i32 = arith.constant 0 : i32
    %c0_i32_0 = arith.constant 0 : i32
    return %1, %c0_i32 : i32, i32
  }
  func.func @transform_4(%arg0: i32, %arg1: i32) -> (i32, i32, i32) {
    %c0_i32 = arith.constant 0 : i32
    %c0_i32_0 = arith.constant 0 : i32
    %c0_i32_1 = arith.constant 0 : i32
    return %arg0, %c0_i32, %c0_i32_0 : i32, i32, i32
  }
}

</mosaic_0001>

<bundles_post_ra>
// kernel: tpu_custom_call.1
= control target key start
LH: loop header
LB: loop body
LE: loop exit
PB: predicated region body
PF: predicated region fallthrough
CT: control target
= control target key end

     0   :  { %9 = vsyncpa [#allocation5], 0  ;;  %s407_s0 = inlined_call_operand.hbm [shape: f32[16,128], index: 0, kind: input, shape index: {}]   ;;  %s408_s1 = inlined_call_operand.hbm [shape: f32[16,128], index: 1, kind: input, shape index: {}]   ;;  %s409_s2 = inlined_call_operand.hbm [shape: f32[16,128], index: 2, kind: input, shape index: {}]   ;;  %s410_s3 = inlined_call_operand.hbm [shape: f32[16,128], index: 3, kind: input, shape index: {}]   ;;  %s411_s4 = inlined_call_operand.hbm [shape: f32[1,2,128], index: 4, kind: output, shape index: {}]  }
   0x1   :  { %10 = vsyncpa [#allocation8], 0 }
   0x2   :  { %11 = vsyncpa [#allocation11], 0 }
   0x3   :  { %12 = vsyncpa [#allocation6], 0  ;;  %s289_s15 = smov [#allocation7]   ;;  %s290_s17 = smov [#allocation4]  }
   0x4   :  { %s38_s16 = sshll.u32 %s289_s15, 4  ;;  %s22_s18 = sshll.u32 %s290_s17, 4  ;;  %s39_s16 = int_to_ptr.vmem [resolvable:$true] %s38_s16  ;;  %s321_s18 = int_to_ptr.vmem [resolvable:$true] %s22_s18 }
   0x5   :  { %s171_s21 = scalar_lea.hbm %s408_s1, 256 }
   0x6   :  { %p172_p0 = scmp.ne.s32.totalorder %s408_s1, %s171_s21  ;;  %p175_p1 = scmp.lt.u32.totalorder %s171_s21, %s408_s1 }
   0x8   :  { %p177_p2 = pnand %p175_p1, %p172_p0 }
   0xa   :  { %180 = shalt.err (!%p177_p2)
}
   0xb   :  { %s181_s26 = scalar_lea.vmem %s39_s16, 256  ;;  %p186_p4 = scmp.lt.s32.totalorder %s39_s16, %s39_s16 }
   0xc   :  { %p182_p3 = scmp.ne.s32.totalorder %s39_s16, %s181_s26  ;;  %p187_p5 = scmp.lt.s32.totalorder %s181_s26, %s181_s26 }
   0xe   :  { %p188_p6 = por %p187_p5, %p186_p4 }
  0x10   :  { %p189_p7 = pnand %p188_p6, %p182_p3 }
  0x12   :  { %192 = shalt.err (!%p189_p7)
}
  0x13   :  { %s291_s27 = smov 128   ;;  %s292_s28 = smov 8  }
  0x14   :  { %44 = dma.hbm_to_vmem [thread:$0]  %s408_s1, 256, %s39_s16, [#allocation8], %s291_s27, %s291_s27, %s292_s28  }
  0x15   :  { %s193_s7 = scalar_lea.hbm %s407_s0, 256 }
  0x16   :  { %p194_p8 = scmp.ne.s32.totalorder %s407_s0, %s193_s7  ;;  %p197_p9 = scmp.lt.u32.totalorder %s193_s7, %s407_s0 }
  0x18   :  { %p199_p10 = pnand %p197_p9, %p194_p8 }
  0x1a   :  { %202 = shalt.err (!%p199_p10)
}
  0x1b   :  { %s203_s12 = scalar_lea.vmem %s321_s18, 256  ;;  %p208_p12 = scmp.lt.s32.totalorder %s321_s18, %s321_s18 }
  0x1c   :  { %p204_p11 = scmp.ne.s32.totalorder %s321_s18, %s203_s12  ;;  %p209_p13 = scmp.lt.s32.totalorder %s203_s12, %s203_s12 }
  0x1e   :  { %p210_p0 = por %p209_p13, %p208_p12 }
  0x20   :  { %p211_p1 = pnand %p210_p0, %p204_p11 }
  0x22   :  { %214 = shalt.err (!%p211_p1)
}
  0x23   :  { %28 = dma.hbm_to_vmem [thread:$0]  %s407_s0, 256, %s321_s18, [#allocation5], %s291_s27, %s291_s27, %s292_s28  }
  0x24   :  { %s293_s14 = smov [#allocation9]   ;;  %s294_s16 = smov [#allocation10]  }
  0x25   :  { %s54_s15 = sshll.u32 %s293_s14, 4  ;;  %s70_s17 = sshll.u32 %s294_s16, 4  ;;  %s55_s15 = int_to_ptr.vmem [resolvable:$true] %s54_s15  ;;  %s358_s17 = int_to_ptr.vmem [resolvable:$true] %s70_s17 }
  0x26   :  { %s215_s21 = scalar_lea.hbm %s409_s2, 256 }
  0x27   :  { %p216_p2 = scmp.ne.s32.totalorder %s409_s2, %s215_s21  ;;  %p219_p3 = scmp.lt.u32.totalorder %s215_s21, %s409_s2 }
  0x29   :  { %p221_p4 = pnand %p219_p3, %p216_p2 }
  0x2b   :  { %224 = shalt.err (!%p221_p4)
}
  0x2c   :  { %s225_s0 = scalar_lea.vmem %s55_s15, 256  ;;  %p230_p6 = scmp.lt.s32.totalorder %s55_s15, %s55_s15 }
  0x2d   :  { %p226_p5 = scmp.ne.s32.totalorder %s55_s15, %s225_s0  ;;  %p231_p7 = scmp.lt.s32.totalorder %s225_s0, %s225_s0 }
  0x2f   :  { %p232_p8 = por %p231_p7, %p230_p6 }
  0x31   :  { %p233_p9 = pnand %p232_p8, %p226_p5 }
  0x33   :  { %236 = shalt.err (!%p233_p9)
}
  0x34   :  { %60 = dma.hbm_to_vmem [thread:$0]  %s409_s2, 256, %s55_s15, [#allocation8], %s291_s27, %s291_s27, %s292_s28  }
  0x35   :  { %s237_s5 = scalar_lea.hbm %s410_s3, 256 }
  0x36   :  { %p238_p10 = scmp.ne.s32.totalorder %s410_s3, %s237_s5  ;;  %p241_p11 = scmp.lt.u32.totalorder %s237_s5, %s410_s3 }
  0x38   :  { %p243_p12 = pnand %p241_p11, %p238_p10 }
  0x3a   :  { %246 = shalt.err (!%p243_p12)
}
  0x3b   :  { %s247_s10 = scalar_lea.vmem %s358_s17, 256  ;;  %p252_p0 = scmp.lt.s32.totalorder %s358_s17, %s358_s17 }
  0x3c   :  { %p248_p13 = scmp.ne.s32.totalorder %s358_s17, %s247_s10  ;;  %p253_p1 = scmp.lt.s32.totalorder %s247_s10, %s247_s10 }
  0x3e   :  { %p254_p2 = por %p253_p1, %p252_p0 }
  0x40   :  { %p255_p3 = pnand %p254_p2, %p248_p13 }
  0x42   :  { %258 = shalt.err (!%p255_p3)
}
  0x43   :  { %76 = dma.hbm_to_vmem [thread:$0]  %s410_s3, 256, %s358_s17, [#allocation11], %s291_s27, %s291_s27, %s292_s28  }
  0x44   :  { %281 = dma.done.wait [#allocation5], 256  }
  0x45   :  { %282 = vsyncadd [#allocation5], 4294967040 }
  0x46   :  { %283 = dma.done.wait [#allocation8], 512  }
  0x47   :  { %284 = vsyncadd [#allocation8], 4294966784 }
  0x48   :  { %285 = dma.done.wait [#allocation11], 256  }
  0x49   :  { %286 = vsyncadd [#allocation11], 4294967040  ;;  %v103_v0 = vld [vmem:[#allocation4] sm:$0xff]  ;;  %v104_v1 = vld [vmem:[#allocation4 + $0x8] sm:$0xff]  ;;  %s295_s3 = smov [#allocation12]   ;;  %vm144_vm0 = vcmask 1040384  }
  0x4a   :  { %v105_v2 = vld [vmem:[#allocation7] sm:$0xff]  ;;  %v106_v3 = vld [vmem:[#allocation7 + $0x8] sm:$0xff]  ;;  %v115_v5 = vld [vmem:[#allocation9] sm:$0xff]  ;;  %s153_s27 = sshll.u32 %s295_s3, 4  ;;  %s154_s27 = int_to_ptr.vmem [resolvable:$true] %s153_s27 }
  0x4b   :  { %v107_v4 = vsub.f32 %v103_v0, %v105_v2  ;;  %v116_v6 = vld [vmem:[#allocation9 + $0x8] sm:$0xff]  ;;  %v108_v7 = vsub.f32 %v104_v1, %v106_v3  ;;  %v117_v8 = vld [vmem:[#allocation10] sm:$0xff]  ;;  %v118_v9 = vld [vmem:[#allocation10 + $0x8] sm:$0xff]  ;;  %s259_s28 = scalar_lea.vmem %s154_s27, 32  ;;  %p264_p5 = scmp.lt.s32.totalorder %s154_s27, %s154_s27 }
  0x4c   :  { %v119_v11 = vsub.f32 %v115_v5, %v117_v8  ;;  %v120_v12 = vsub.f32 %v116_v6, %v118_v9  ;;  %p260_p4 = scmp.ne.s32.totalorder %s154_s27, %s259_s28  ;;  %p265_p6 = scmp.lt.s32.totalorder %s259_s28, %s259_s28 }
  0x4d   :  { %v109_v10 = vmul.f32 %v107_v4, %v107_v4  ;;  %v110_v13 = vmul.f32 %v108_v7, %v108_v7 }
  0x4e   :  { %v121_v14 = vand.u32 2147483647, %v119_v11  ;;  %v122_v15 = vand.u32 2147483647, %v120_v12  ;;  %p266_p7 = por %p265_p6, %p264_p5 }
  0x4f   :  { %v112_v16 = vadd.f32 %v110_v13, %v109_v10 }
  0x50   :  { %v124_v17 = vadd.f32 %v122_v15, %v121_v14  ;;  %p267_p8 = pnand %p266_p7, %p260_p4 }
  0x51   :  { %v131_v18 = vrot.slane %v112_v16, 4 }
  0x52   :  { %v138_v19 = vrot.slane %v124_v17, 4 }
  0x53   :  { %v132_v20 = vadd.f32 %v131_v18, %v112_v16 }
  0x54   :  { %v139_v21 = vadd.f32 %v138_v19, %v124_v17 }
  0x55   :  { %v133_v22 = vrot.slane %v132_v20, 2 }
  0x56   :  { %v140_v23 = vrot.slane %v139_v21, 2 }
  0x57   :  { %v134_v24 = vadd.f32 %v133_v22, %v132_v20 }
  0x58   :  { %v141_v25 = vadd.f32 %v140_v23, %v139_v21 }
  0x59   :  { %v135_v26 = vrot.slane %v134_v24, 1 }
  0x5a   :  { %v142_v27 = vrot.slane %v141_v25, 1 }
  0x5b   :  { %v136_v28 = vadd.f32 %v135_v26, %v134_v24 }
  0x5c   :  { %v143_v29 = vadd.f32 %v142_v27, %v141_v25 }
  0x5e   :  { %v145_v30 = vsel %vm144_vm0, %v136_v28, %v143_v29 }
  0x5f   :  { %146 = vst [vmem:[#allocation12] sm:$0x3] %v145_v30 }
  0x60   :  { %270 = shalt.err (!%p267_p8)
}
  0x61   :  { %s271_s13 = scalar_lea.hbm %s411_s4, 32 }
  0x62   :  { %p272_p9 = scmp.ne.s32.totalorder %s411_s4, %s271_s13  ;;  %p275_p10 = scmp.lt.u32.totalorder %s271_s13, %s411_s4 }
  0x64   :  { %p277_p11 = pnand %p275_p10, %p272_p9 }
  0x66   :  { %280 = shalt.err (!%p277_p11)
}
  0x67   :  { %156 = dma.vmem_to_hbm [thread:$0]  %s154_s27, 32, %s411_s4, [#allocation6]  }
  0x68   :  { %287 = dma.done.wait [#allocation6], 32  }
  0x69   :  { %288 = vsyncadd [#allocation6], 4294967264 }
  0x6a   :  { %160 = vsyncpa [#allocation5], 1 }
  0x6b   :  { %161 = vsyncpa [#allocation8], 1 }
  0x6c   :  { %162 = vsyncpa [#allocation11], 1 }
  0x6d   :  { %163 = vsyncpa [#allocation6], 1 }

</bundles_post_ra>
